<compile_context>
chip_gen: v7x
topology: tpu7x:2x2x1
jax: 0.10.0
libtpu: 0.0.40
codegen_flags: <defaults>
</compile_context>

<pallas_src>
import jax
import jax.numpy as jnp
from jax.experimental import pallas as pl
from jax.experimental.pallas import tpu as pltpu


# ---------------------------------------------------------------------------
# Fused kernel: one grid step = a block of whole batches, x flattened to
# (Bb, C*L) with the (channel, position) pair packed onto the lane axis.
#   h        = relu( x_flat @ (repeat(W1^T, L) / L) )        # mean folded in
#   ca_lanes = sigmoid( h @ repeat(W2^T, L, axis=1) )         # gate, per lane
#   conv     = taps[0]*x[l-1] + taps[1]*x[l] + taps[2]*x[l+1] # via roll+mask
#   out      = x * ca_lanes * sigmoid(conv)
# ---------------------------------------------------------------------------
def _make_fused_kernel(seq_len: int):
    def kernel(x_ref, msw1_ref, w2l_ref, taps_ref, o_ref):
        x = x_ref[...].astype(jnp.float32)                       # (Bb, C*L)
        cl = x.shape[1]

        # ---- channel attention (mean over L folded into the first matmul) ----
        h = jnp.dot(x, msw1_ref[...], preferred_element_type=jnp.float32)   # (Bb, H)
        h = jnp.maximum(h, 0.0)
        # Lane-expanded W2^T: column c*L+l holds W2^T[:, c], so the sigmoid of
        # the product is the per-channel gate already replicated over its L lanes.
        ca = jax.nn.sigmoid(
            jnp.dot(h, w2l_ref[...], preferred_element_type=jnp.float32))   # (Bb, C*L)

        # ---- depthwise conv k=3 / padding=1 via XLU roll + lane masks ----
        lane = jax.lax.broadcasted_iota(jnp.int32, x.shape, 1)
        pos = lane % seq_len                                      # l within a channel
        # roll(+1): position j holds x[j-1]; zero where l == 0 (channel boundary).
        x_prev = jnp.where(pos == 0, 0.0, pltpu.roll(x, 1, axis=1))
        # roll(cl-1) == roll(-1): position j holds x[j+1]; zero where l == L-1.
        x_next = jnp.where(pos == seq_len - 1, 0.0, pltpu.roll(x, cl - 1, axis=1))

        taps = taps_ref[...]                                      # (3, C*L)
        conv = (taps[0:1, :] * x_prev
                + taps[1:2, :] * x
                + taps[2:3, :] * x_next)
        sa = jax.nn.sigmoid(conv)                                 # EUP

        o_ref[...] = (x * ca * sa).astype(o_ref.dtype)

    return kernel


def _pick_batch_block(n_batch: int, bytes_per_batch: int) -> int:
    """Whole batches per grid step for the fused kernel.

    Goals: (a) whole batches per block (the in-block MLP mean needs them),
    (b) row dim a multiple of 8 or equal to the full batch dim (sublane rule),
    (c) ~2 MiB of x per block so in/out double buffering plus the fused body's
    f32 intermediates stay inside a 32 MiB scoped-VMEM limit on v5e/v6e/v7x,
    (d) >= 2 balanced grid steps (ideally an even count, no tiny tail) so both
    v7x TensorCores get work.
    """
    if n_batch <= 8:
        return n_batch
    budget = 2 * 1024 * 1024
    bb = (budget // max(bytes_per_batch, 1)) // 8 * 8
    bb = max(8, min(bb, max(8, (n_batch // 2) // 8 * 8)))
    # Prefer a block size that tiles n_batch exactly into an even step count.
    for cand in range(bb, 7, -8):
        if n_batch % cand == 0 and (n_batch // cand) % 2 == 0:
            return cand
    return bb


def dual_attention(x, w1, w2, wc):
    """x: (B, C, L); w1: (C//r, C); w2: (C, C//r); wc: (C, 3) depthwise taps."""
    B, C, L = x.shape
    H = w1.shape[0]
    f32 = jnp.float32
    CL = C * L

    # Folded first MLP weight: row c*L+l holds W1^T[c, :] / L, so
    # x_flat @ msw1 == mean_L(x) @ W1^T.
    msw1 = jnp.repeat(w1.T.astype(f32), L, axis=0) / jnp.float32(L)   # (C*L, H)
    # Lane-expanded second MLP weight: column c*L+l holds W2^T[:, c].
    w2l = jnp.repeat(w2.T.astype(f32), L, axis=1)                      # (H, C*L)
    # Lane-expanded depthwise taps: row k, column c*L+l holds wc[c, k].
    taps = jnp.repeat(wc.T.astype(f32), L, axis=1)                     # (3, C*L)

    x_flat = x.reshape(B, CL)                                          # free reshape
    Bb = _pick_batch_block(B, CL * x.dtype.itemsize)
    num_steps = pl.cdiv(B, Bb)

    # NOTE: one batch (C*L*itemsize bytes) must fit the ~2 MiB block budget;
    # for very large C*L a C-split (two-pass) variant would be needed.
    out_flat = pl.pallas_call(
        _make_fused_kernel(L),
        out_shape=jax.ShapeDtypeStruct((B, CL), x.dtype),
        grid_spec=pltpu.PrefetchScalarGridSpec(
            num_scalar_prefetch=0,
            grid=(num_steps,),
            in_specs=[
                pl.BlockSpec((Bb, CL), lambda b: (b, 0)),   # x (whole batches)
                pl.BlockSpec((CL, H), lambda b: (0, 0)),    # mean-folded W1^T
                pl.BlockSpec((H, CL), lambda b: (0, 0)),    # lane-expanded W2^T
                pl.BlockSpec((3, CL), lambda b: (0, 0)),    # lane-expanded conv taps
            ],
            out_specs=pl.BlockSpec((Bb, CL), lambda b: (b, 0)),
        ),
        compiler_params=pltpu.CompilerParams(
            dimension_semantics=("parallel",),
            vmem_limit_bytes=32 * 1024 * 1024,
        ),
    )(x_flat, msw1, w2l, taps)
    return out_flat.reshape(B, C, L)


def dual_attention_reference(x, w1, w2, wc):
    # pure-JAX reference mirroring the PyTorch forward
    ca = x.mean(axis=2)                              # (B, C)
    h = jnp.maximum(ca @ w1.T, 0.0)                  # (B, H)
    ca = jax.nn.sigmoid(h @ w2.T)[..., None]         # (B, C, 1)
    x_ca = x * ca
    xp = jnp.pad(x, ((0, 0), (0, 0), (1, 1)))
    conv = (wc[None, :, 0:1] * xp[:, :, :-2]
            + wc[None, :, 1:2] * xp[:, :, 1:-1]
            + wc[None, :, 2:3] * xp[:, :, 2:])
    sa = jax.nn.sigmoid(conv)
    return x_ca * sa


if __name__ == "__main__":
    B, C, L = 2, 32, 16
    reduction = 8
    H = C // reduction                               # 4

    key = jax.random.PRNGKey(0)
    kx, k1, k2, k3 = jax.random.split(key, 4)
    x = jax.random.normal(kx, (B, C, L), dtype=jnp.float32)
    # nn.Linear(channels, channels//reduction, bias=False) -> weight (H, C)
    w1 = jax.random.normal(k1, (H, C), dtype=jnp.float32) * 0.1
    # nn.Linear(channels//reduction, channels, bias=False) -> weight (C, H)
    w2 = jax.random.normal(k2, (C, H), dtype=jnp.float32) * 0.1
    # nn.Conv1d(C, C, 3, padding=1, groups=C, bias=False) -> weight (C, 1, 3) stored as (C, 3)
    wc = jax.random.normal(k3, (C, 3), dtype=jnp.float32) * 0.1

    out = jax.block_until_ready(dual_attention(x, w1, w2, wc))
    ref = jax.block_until_ready(dual_attention_reference(x, w1, w2, wc))

    assert out.shape == (B, C, L)
    assert jnp.allclose(out, ref, atol=1e-5, rtol=1e-5), \
        f"max abs err {jnp.max(jnp.abs(out - ref))}"
    print("KERNEL_OK")
</pallas_src>

<mosaic_0001>
module attributes {stable_mosaic.version = 11 : i64} {
  func.func @kernel(%arg0: i32, %arg1: memref<2x512xf32, #tpu.memory_space<vmem>>, %arg2: memref<512x4xf32, #tpu.memory_space<vmem>>, %arg3: memref<4x512xf32, #tpu.memory_space<vmem>>, %arg4: memref<3x512xf32, #tpu.memory_space<vmem>>, %arg5: memref<2x512xf32, #tpu.memory_space<vmem>>) attributes {dimension_semantics = [#tpu.dimension_semantics<parallel>], iteration_bounds = array<i64: 1>, scalar_prefetch = 0 : i64, scratch_operands = 0 : i64, tpu.core_type = #tpu.core_type<tc>, window_params = [{transform_indices = @transform_0, window_bounds = array<i64: 2, 512>}, {pipeline_mode = #tpu.pipeline_mode<synchronous>, transform_indices = @transform_1, window_bounds = array<i64: 512, 4>}, {pipeline_mode = #tpu.pipeline_mode<synchronous>, transform_indices = @transform_2, window_bounds = array<i64: 4, 512>}, {pipeline_mode = #tpu.pipeline_mode<synchronous>, transform_indices = @transform_3, window_bounds = array<i64: 3, 512>}, {transform_indices = @transform_4, window_bounds = array<i64: 2, 512>}]} {
    %c0 = arith.constant 0 : index
    %c0_0 = arith.constant 0 : index
    %0 = vector.load %arg1[%c0, %c0_0] : memref<2x512xf32, #tpu.memory_space<vmem>>, vector<2x512xf32>
    %c0_1 = arith.constant 0 : index
    %c0_2 = arith.constant 0 : index
    %1 = vector.load %arg2[%c0_1, %c0_2] : memref<512x4xf32, #tpu.memory_space<vmem>>, vector<512x4xf32>
    %cst = arith.constant dense<0.000000e+00> : vector<2x4xf32>
    %2 = tpu.matmul %0, %1, %cst {dimension_numbers = #tpu.dot_dimension_numbers<[1], [0], [0], [1], [0, 0, 1, 1], [], []>} : vector<2x512xf32>, vector<512x4xf32>, vector<2x4xf32> -> vector<2x4xf32>
    %cst_3 = arith.constant 0.000000e+00 : f32
    %3 = vector.broadcast %cst_3 : f32 to vector<2x4xf32>
    %4 = arith.maximumf %2, %3 : vector<2x4xf32>
    %c0_4 = arith.constant 0 : index
    %c0_5 = arith.constant 0 : index
    %5 = vector.load %arg3[%c0_4, %c0_5] : memref<4x512xf32, #tpu.memory_space<vmem>>, vector<4x512xf32>
    %cst_6 = arith.constant dense<0.000000e+00> : vector<2x512xf32>
    %6 = tpu.matmul %4, %5, %cst_6 {dimension_numbers = #tpu.dot_dimension_numbers<[1], [0], [0], [1], [0, 0, 1, 1], [], []>} : vector<2x4xf32>, vector<4x512xf32>, vector<2x512xf32> -> vector<2x512xf32>
    %7 = arith.negf %6 : vector<2x512xf32>
    %8 = math.exp %7 : vector<2x512xf32>
    %cst_7 = arith.constant 1.000000e+00 : f32
    %9 = vector.broadcast %cst_7 : f32 to vector<2x512xf32>
    %10 = arith.addf %9, %8 : vector<2x512xf32>
    %11 = arith.divf %9, %10 : vector<2x512xf32>
    %12 = tpu.iota {dimensions = array<i32: 1>} : vector<2x512xi32>
    %c16_i32 = arith.constant 16 : i32
    %c0_i32 = arith.constant 0 : i32
    %13 = arith.cmpi eq, %c16_i32, %c0_i32 : i32
    %c1_i32 = arith.constant 1 : i32
    %14 = arith.select %13, %c1_i32, %c16_i32 : i32
    %15 = vector.broadcast %14 : i32 to vector<2x512xi32>
    %16 = arith.remsi %12, %15 : vector<2x512xi32>
    %c0_i32_8 = arith.constant 0 : i32
    %17 = vector.broadcast %c0_i32_8 : i32 to vector<2x512xi32>
    %18 = arith.cmpi ne, %16, %17 : vector<2x512xi32>
    %c0_i32_9 = arith.constant 0 : i32
    %19 = vector.broadcast %c0_i32_9 : i32 to vector<2x512xi32>
    %20 = arith.cmpi slt, %16, %19 : vector<2x512xi32>
    %c0_i32_10 = arith.constant 0 : i32
    %21 = arith.cmpi slt, %14, %c0_i32_10 : i32
    %22 = vector.broadcast %21 : i1 to vector<2x512xi1>
    %23 = vector.broadcast %22 : vector<2x512xi1> to vector<2x512xi1>
    %24 = arith.xori %20, %23 : vector<2x512xi1>
    %25 = arith.andi %24, %18 : vector<2x512xi1>
    %26 = vector.broadcast %14 : i32 to vector<2x512xi32>
    %27 = arith.addi %16, %26 : vector<2x512xi32>
    %28 = arith.select %25, %27, %16 : vector<2x512xi1>, vector<2x512xi32>
    %c0_i32_11 = arith.constant 0 : i32
    %29 = vector.broadcast %c0_i32_11 : i32 to vector<2x512xi32>
    %30 = arith.cmpi eq, %28, %29 : vector<2x512xi32>
    %c1_i32_12 = arith.constant 1 : i32
    %31 = tpu.dynamic_rotate %0 by %c1_i32_12 dim 1 : vector<2x512xf32>, i32 -> vector<2x512xf32>
    %cst_13 = arith.constant 0.000000e+00 : f32
    %32 = vector.broadcast %cst_13 : f32 to vector<2x512xf32>
    %33 = arith.select %30, %32, %31 : vector<2x512xi1>, vector<2x512xf32>
    %c15_i32 = arith.constant 15 : i32
    %34 = vector.broadcast %c15_i32 : i32 to vector<2x512xi32>
    %35 = arith.cmpi eq, %28, %34 : vector<2x512xi32>
    %c511_i32 = arith.constant 511 : i32
    %36 = tpu.dynamic_rotate %0 by %c511_i32 dim 1 : vector<2x512xf32>, i32 -> vector<2x512xf32>
    %cst_14 = arith.constant 0.000000e+00 : f32
    %37 = vector.broadcast %cst_14 : f32 to vector<2x512xf32>
    %38 = arith.select %35, %37, %36 : vector<2x512xi1>, vector<2x512xf32>
    %c0_15 = arith.constant 0 : index
    %c0_16 = arith.constant 0 : index
    %39 = vector.load %arg4[%c0_15, %c0_16] : memref<3x512xf32, #tpu.memory_space<vmem>>, vector<3x512xf32>
    %40 = vector.extract_strided_slice %39 {offsets = [0, 0], sizes = [1, 512], strides = [1, 1]} : vector<3x512xf32> to vector<1x512xf32>
    %41 = vector.broadcast %40 : vector<1x512xf32> to vector<2x512xf32>
    %42 = arith.mulf %41, %33 : vector<2x512xf32>
    %43 = vector.extract_strided_slice %39 {offsets = [1, 0], sizes = [1, 512], strides = [1, 1]} : vector<3x512xf32> to vector<1x512xf32>
    %44 = vector.broadcast %43 : vector<1x512xf32> to vector<2x512xf32>
    %45 = arith.mulf %44, %0 : vector<2x512xf32>
    %46 = arith.addf %42, %45 : vector<2x512xf32>
    %47 = vector.extract_strided_slice %39 {offsets = [2, 0], sizes = [1, 512], strides = [1, 1]} : vector<3x512xf32> to vector<1x512xf32>
    %48 = vector.broadcast %47 : vector<1x512xf32> to vector<2x512xf32>
    %49 = arith.mulf %48, %38 : vector<2x512xf32>
    %50 = arith.addf %46, %49 : vector<2x512xf32>
    %51 = arith.negf %50 : vector<2x512xf32>
    %52 = math.exp %51 : vector<2x512xf32>
    %cst_17 = arith.constant 1.000000e+00 : f32
    %53 = vector.broadcast %cst_17 : f32 to vector<2x512xf32>
    %54 = arith.addf %53, %52 : vector<2x512xf32>
    %55 = arith.divf %53, %54 : vector<2x512xf32>
    %56 = arith.mulf %0, %11 : vector<2x512xf32>
    %57 = arith.mulf %56, %55 : vector<2x512xf32>
    %c0_18 = arith.constant 0 : index
    %c0_19 = arith.constant 0 : index
    %58 = vector.load %arg5[%c0_18, %c0_19] : memref<2x512xf32, #tpu.memory_space<vmem>>, vector<2x512xf32>
    tpu.vector_store %arg5[%c0_18, %c0_19], %57 {strides = array<i32>} : memref<2x512xf32, #tpu.memory_space<vmem>>, vector<2x512xf32>,
    return
  }
  func.func @transform_0(%arg0: i32) -> (i32, i32) {
    %c0_i32 = arith.constant 0 : i32
    %c0_i32_0 = arith.constant 0 : i32
    return %arg0, %c0_i32 : i32, i32
  }
  func.func @transform_1(%arg0: i32) -> (i32, i32) {
    %c0_i32 = arith.constant 0 : i32
    %c0_i32_0 = arith.constant 0 : i32
    %c0_i32_1 = arith.constant 0 : i32
    return %c0_i32, %c0_i32_0 : i32, i32
  }
  func.func @transform_2(%arg0: i32) -> (i32, i32) {
    %c0_i32 = arith.constant 0 : i32
    %c0_i32_0 = arith.constant 0 : i32
    %c0_i32_1 = arith.constant 0 : i32
    return %c0_i32, %c0_i32_0 : i32, i32
  }
  func.func @transform_3(%arg0: i32) -> (i32, i32) {
    %c0_i32 = arith.constant 0 : i32
    %c0_i32_0 = arith.constant 0 : i32
    %c0_i32_1 = arith.constant 0 : i32
    return %c0_i32, %c0_i32_0 : i32, i32
  }
  func.func @transform_4(%arg0: i32) -> (i32, i32) {
    %c0_i32 = arith.constant 0 : i32
    %c0_i32_0 = arith.constant 0 : i32
    return %arg0, %c0_i32 : i32, i32
  }
}

</mosaic_0001>

<bundles_post_ra>
// kernel: tpu_custom_call.1
= control target key start
LH: loop header
LB: loop body
LE: loop exit
PB: predicated region body
PF: predicated region fallthrough
CT: control target
= control target key end

     0   :  { %v955_v47 = vmov 1983009808   ;;  %v88_v49 = vlaneseq  ;;  %s1365_s0 = inlined_call_operand.vmem [shape: f32[2,512], index: 0, kind: input, shape index: {}]   ;;  %s1366_s1 = inlined_call_operand.vmem [shape: f32[512,4], index: 1, kind: input, shape index: {}]   ;;  %s1367_s2 = inlined_call_operand.vmem [shape: f32[4,512], index: 2, kind: input, shape index: {}]   ;;  %s1368_s3 = inlined_call_operand.vmem [shape: f32[3,512], index: 3, kind: input, shape index: {}]   ;;  %s1369_s4 = inlined_call_operand.hbm [shape: f32[2,512], index: 4, kind: output, shape index: {}]  }
   0x1   :  { %v35_v0 = vld [vmem:[%s1366_s1 + $0x80] sm:$0xff]  ;;  %v36_v1 = vld [vmem:[%s1366_s1 + $0x88] sm:$0xff]  ;;  %v37_v11 = vld [vmem:[%s1366_s1 + $0x90] sm:$0xff]  ;;  %v86_v48 = vunpack.c.l.s4 %v955_v47 }
   0x2   :  { %v67_v2 = vld [vmem:[%s1366_s1 + $0x180] sm:$0xff]  ;;  %v827_v3 = vpack.c.bf16 %v36_v1, %v35_v0  ;;  %v68_v4 = vld [vmem:[%s1366_s1 + $0x188] sm:$0xff]  ;;  %v38_v13 = vld [vmem:[%s1366_s1 + $0x98] sm:$0xff]  ;;  %v1112_v0 = vshrl.u32 %v88_v49, 7 }
   0x3   :  { %v19_v5 = vld [vmem:[%s1366_s1] sm:$0xff]  ;;  %v20_v6 = vld [vmem:[%s1366_s1 + $0x8] sm:$0xff]  ;;  %v859_v7 = vpack.c.bf16 %v68_v4, %v67_v2  ;;  %v69_v14 = vld [vmem:[%s1366_s1 + $0x190] sm:$0xff]  ;;  %v831_v16 = vpack.c.bf16 %v38_v13, %v37_v11  ;;  %v87_v63 = vunpack.c.0.s8 %v86_v48 }
   0x4   :  { %v829_v8 = vpack.c.bf16 %v20_v6, %v19_v5  ;;  %v51_v9 = vld [vmem:[%s1366_s1 + $0x100] sm:$0xff]  ;;  %v52_v10 = vld [vmem:[%s1366_s1 + $0x108] sm:$0xff]  ;;  %828 = vmatprep.subr.bf16.mxu0 %v827_v3  ;;  %v70_v15 = vld [vmem:[%s1366_s1 + $0x198] sm:$0xff] }
   0x5   :  { %v861_v12 = vpack.c.bf16 %v52_v10, %v51_v9  ;;  %860 = vmatprep.subr.bf16.mxu1 %v859_v7  ;;  %v863_v17 = vpack.c.bf16 %v70_v15, %v69_v14  ;;  %v21_v18 = vld [vmem:[%s1366_s1 + $0x10] sm:$0xff]  ;;  %v22_v19 = vld [vmem:[%s1366_s1 + $0x18] sm:$0xff]  ;;  %v39_v23 = vld [vmem:[%s1366_s1 + $0xa0] sm:$0xff]  ;;  %v1139_v13 = vsub.s32 %v87_v63, %v1112_v0 }
   0x6   :  { %830 = vmatpush3.bf16.msra.mxu0 %v829_v8  ;;  %v53_v20 = vld [vmem:[%s1366_s1 + $0x110] sm:$0xff]  ;;  %v833_v21 = vpack.c.bf16 %v22_v19, %v21_v18  ;;  %v54_v22 = vld [vmem:[%s1366_s1 + $0x118] sm:$0xff]  ;;  %v40_v24 = vld [vmem:[%s1366_s1 + $0xa8] sm:$0xff] }
   0x7   :  { %862 = vmatpush3.bf16.msra.mxu1 %v861_v12  ;;  %832 = vmatprep.subr.bf16.mxu0 %v831_v16  ;;  %v865_v25 = vpack.c.bf16 %v54_v22, %v53_v20  ;;  %v835_v26 = vpack.c.bf16 %v40_v24, %v39_v23  ;;  %v71_v27 = vld [vmem:[%s1366_s1 + $0x1a0] sm:$0xff]  ;;  %v72_v28 = vld [vmem:[%s1366_s1 + $0x1a8] sm:$0xff]  ;;  %v41_v35 = vld [vmem:[%s1366_s1 + $0xb0] sm:$0xff] }
   0x8   :  { %864 = vmatprep.subr.bf16.mxu1 %v863_v17  ;;  %v23_v29 = vld [vmem:[%s1366_s1 + $0x20] sm:$0xff]  ;;  %v867_v30 = vpack.c.bf16 %v72_v28, %v71_v27  ;;  %v24_v31 = vld [vmem:[%s1366_s1 + $0x28] sm:$0xff]  ;;  %v42_v36 = vld [vmem:[%s1366_s1 + $0xb8] sm:$0xff] }
   0x9   :  { %v55_v32 = vld [vmem:[%s1366_s1 + $0x120] sm:$0xff]  ;;  %v56_v33 = vld [vmem:[%s1366_s1 + $0x128] sm:$0xff]  ;;  %v837_v34 = vpack.c.bf16 %v24_v31, %v23_v29  ;;  %v73_v37 = vld [vmem:[%s1366_s1 + $0x1b0] sm:$0xff]  ;;  %v839_v39 = vpack.c.bf16 %v42_v36, %v41_v35 }
   0xa   :  { %834 = vmatpush3.bf16.msra.mxu0 %v833_v21  ;;  %v869_v38 = vpack.c.bf16 %v56_v33, %v55_v32  ;;  %v74_v40 = vld [vmem:[%s1366_s1 + $0x1b8] sm:$0xff]  ;;  %v25_v41 = vld [vmem:[%s1366_s1 + $0x30] sm:$0xff]  ;;  %v43_v46 = vld [vmem:[%s1366_s1 + $0xc0] sm:$0xff] }
   0xb   :  { %866 = vmatpush3.bf16.msra.mxu1 %v865_v25  ;;  %836 = vmatprep.subr.bf16.mxu0 %v835_v26  ;;  %v26_v42 = vld [vmem:[%s1366_s1 + $0x38] sm:$0xff]  ;;  %v871_v43 = vpack.c.bf16 %v74_v40, %v73_v37  ;;  %v57_v44 = vld [vmem:[%s1366_s1 + $0x130] sm:$0xff]  ;;  %v44_v50 = vld [vmem:[%s1366_s1 + $0xc8] sm:$0xff] }
   0xc   :  { %868 = vmatprep.subr.bf16.mxu1 %v867_v30  ;;  %v58_v45 = vld [vmem:[%s1366_s1 + $0x138] sm:$0xff]  ;;  %v75_v51 = vld [vmem:[%s1366_s1 + $0x1c0] sm:$0xff]  ;;  %v76_v52 = vld [vmem:[%s1366_s1 + $0x1c8] sm:$0xff]  ;;  %v841_v53 = vpack.c.bf16 %v26_v42, %v25_v41  ;;  %v843_v55 = vpack.c.bf16 %v44_v50, %v43_v46 }
   0xd   :  { %v873_v54 = vpack.c.bf16 %v58_v45, %v57_v44  ;;  %v27_v56 = vld [vmem:[%s1366_s1 + $0x40] sm:$0xff]  ;;  %v28_v57 = vld [vmem:[%s1366_s1 + $0x48] sm:$0xff]  ;;  %v875_v59 = vpack.c.bf16 %v76_v52, %v75_v51  ;;  %v45_v61 = vld [vmem:[%s1366_s1 + $0xd0] sm:$0xff] }
   0xe   :  { %838 = vmatpush3.bf16.msra.mxu0 %v837_v34  ;;  %v59_v58 = vld [vmem:[%s1366_s1 + $0x140] sm:$0xff]  ;;  %v60_v60 = vld [vmem:[%s1366_s1 + $0x148] sm:$0xff]  ;;  %v46_v62 = vld [vmem:[%s1366_s1 + $0xd8] sm:$0xff]  ;;  %v845_v3 = vpack.c.bf16 %v28_v57, %v27_v56 }
   0xf   :  { %870 = vmatpush3.bf16.msra.mxu1 %v869_v38  ;;  %840 = vmatprep.subr.bf16.mxu0 %v839_v39  ;;  %v77_v1 = vld [vmem:[%s1366_s1 + $0x1d0] sm:$0xff]  ;;  %v78_v2 = vld [vmem:[%s1366_s1 + $0x1d8] sm:$0xff]  ;;  %v877_v4 = vpack.c.bf16 %v60_v60, %v59_v58  ;;  %v847_v5 = vpack.c.bf16 %v46_v62, %v45_v61  ;;  %v47_v11 = vld [vmem:[%s1366_s1 + $0xe0] sm:$0xff] }
  0x10   :  { %872 = vmatprep.subr.bf16.mxu1 %v871_v43  ;;  %v29_v6 = vld [vmem:[%s1366_s1 + $0x50] sm:$0xff]  ;;  %v30_v7 = vld [vmem:[%s1366_s1 + $0x58] sm:$0xff]  ;;  %v879_v9 = vpack.c.bf16 %v78_v2, %v77_v1  ;;  %v48_v12 = vld [vmem:[%s1366_s1 + $0xe8] sm:$0xff] }
  0x11   :  { %v61_v8 = vld [vmem:[%s1366_s1 + $0x150] sm:$0xff]  ;;  %v62_v10 = vld [vmem:[%s1366_s1 + $0x158] sm:$0xff]  ;;  %v79_v14 = vld [vmem:[%s1366_s1 + $0x1e0] sm:$0xff]  ;;  %v849_v16 = vpack.c.bf16 %v30_v7, %v29_v6  ;;  %v851_v20 = vpack.c.bf16 %v48_v12, %v47_v11 }
  0x12   :  { %842 = vmatpush3.bf16.msra.mxu0 %v841_v53  ;;  %v80_v15 = vld [vmem:[%s1366_s1 + $0x1e8] sm:$0xff]  ;;  %v31_v17 = vld [vmem:[%s1366_s1 + $0x60] sm:$0xff]  ;;  %v881_v19 = vpack.c.bf16 %v62_v10, %v61_v8 }
  0x13   :  { %874 = vmatpush3.bf16.msra.mxu1 %v873_v54  ;;  %844 = vmatprep.subr.bf16.mxu0 %v843_v55  ;;  %v32_v18 = vld [vmem:[%s1366_s1 + $0x68] sm:$0xff]  ;;  %v63_v21 = vld [vmem:[%s1366_s1 + $0x160] sm:$0xff] }
  0x14   :  { %876 = vmatprep.subr.bf16.mxu1 %v875_v59  ;;  %v1159_v22 = vld [vmem:[%s1365_s0] sm:$0xff] }
  0x16   :  { %846 = vmatpush3.bf16.msra.mxu0 %v845_v3 }
  0x17   :  { %878 = vmatpush3.bf16.msra.mxu1 %v877_v4  ;;  %848 = vmatprep.subr.bf16.mxu0 %v847_v5 }
  0x18   :  { %9 = vsyncpa [#allocation3], 0  ;;  %880 = vmatprep.subr.bf16.mxu1 %v879_v9  ;;  %v883_v23 = vpack.c.bf16 %v80_v15, %v79_v14  ;;  %v64_v24 = vld [vmem:[%s1366_s1 + $0x168] sm:$0xff]  ;;  %v49_v25 = vld [vmem:[%s1366_s1 + $0xf0] sm:$0xff]  ;;  %v1172_v27 = vrot.slane %v1159_v22, %v1139_v13  ;;  %v84_v28 = vcombine.high %v1159_v22, %v1159_v22  ;;  %v853_v31 = vpack.c.bf16 %v32_v18, %v31_v17  ;;  %s957_s17 = smov 1   ;;  %s958_s18 = smov 127  }
  0x19   :  { %v50_v26 = vld [vmem:[%s1366_s1 + $0xf8] sm:$0xff]  ;;  %v81_v29 = vld [vmem:[%s1366_s1 + $0x1f0] sm:$0xff]  ;;  %v885_v34 = vpack.c.bf16 %v64_v24, %v63_v21  ;;  %v246_v44 = vld [vmem:[%s1367_s2] sm:$0xff]  ;;  %vm256_vm0 = vcmask 1043456   ;;  %v956_v48 = vmov 0.0   ;;  %vm252_vm1 = vcmask 31744  }
  0x1a   :  { %v82_v30 = vld [vmem:[%s1366_s1 + $0x1f8] sm:$0xff]  ;;  %850 = vmatpush3.bf16.msra.mxu0 %v849_v16  ;;  %v1184_v32 = vcombine.high %v1172_v27, %v1172_v27  ;;  %v1187_v33 = vrot.slane %v84_v28, %v1139_v13  ;;  %v855_v35 = vpack.c.bf16 %v50_v26, %v49_v25  ;;  %v33_v36 = vld [vmem:[%s1366_s1 + $0x70] sm:$0xff]  ;;  %v247_v45 = vld [vmem:[%s1367_s2 + $0x8] sm:$0xff]  ;;  %v250_v46 = vcombine.high %v246_v44, %v246_v44 }
  0x1b   :  { %882 = vmatpush3.bf16.msra.mxu1 %v881_v19  ;;  %852 = vmatprep.subr.bf16.mxu0 %v851_v20  ;;  %v34_v37 = vld [vmem:[%s1366_s1 + $0x78] sm:$0xff]  ;;  %v887_v38 = vpack.c.bf16 %v82_v30, %v81_v29  ;;  %v65_v39 = vld [vmem:[%s1366_s1 + $0x170] sm:$0xff]  ;;  %v251_v47 = vcombine.high %v247_v45, %v247_v45  ;;  %v1224_v60 = vand.u32 127, %v88_v49  ;;  %v1227_v61 = vsub.s32 1, %v1112_v0  ;;  %v526_v62 = vld [vmem:[%s1368_s3] sm:$0x77] }
  0x1c   :  { %884 = vmatprep.subr.bf16.mxu1 %v883_v23  ;;  %v66_v40 = vld [vmem:[%s1366_s1 + $0x178] sm:$0xff]  ;;  %169 = vmatprep.mubr.f32.mxu0 %v1184_v32  ;;  %v1204_v41 = vcombine.high %v1187_v33, %v1187_v33  ;;  %v857_v42 = vpack.c.bf16 %v34_v37, %v33_v36  ;;  %v1235_v1 = vsub.s32 0, %v1112_v0  ;;  %v536_v2 = vsub.s32 4, %v1112_v0  ;;  %v1243_v49 = vld [vmem:[%s1368_s3 + $0x8] sm:$0x77]  ;;  %s959_s3 = smov [#allocation2]  }
  0x1d   :  { %v889_v43 = vpack.c.bf16 %v66_v40, %v65_v39  ;;  %488 = vrot.lane.b32.xlu0 %v1172_v27, %s957_s17  ;;  %492 = vrot.lane.b32.xlu1 %v1187_v33, %s957_s17  ;;  %v576_v3 = vsub.s32 5, %v1112_v0  ;;  %v435_v4 = vadd.s32 384, %v1224_v60  ;;  %v573_v6 = vrot.slane %v526_v62, %v1227_v61  ;;  %s735_s22 = sshll.u32 %s959_s3, 4  ;;  %s736_s22 = int_to_ptr.vmem [resolvable:$true] %s735_s22 }
  0x1e   :  { %854 = vmatpush3.bf16.msra.mxu0 %v853_v31  ;;  %239 = vmatprep.mubr.f32.mxu1 %v1204_v41  ;;  %v433_v7 = vadd.s32 128, %v1224_v60  ;;  %v434_v8 = vadd.s32 256, %v1224_v60  ;;  %v440_v9 = vand.u32 15, %v1224_v60  ;;  %v533_v10 = vrot.slane %v526_v62, %v1235_v1  ;;  %s931_s23 = scalar_lea.vmem %s736_s22, 128  ;;  %p936_p1 = scmp.lt.s32.totalorder %s736_s22, %s736_s22 }
  0x1f   :  { %886 = vmatpush3.bf16.msra.mxu1 %v885_v34  ;;  %856 = vmatprep.subr.bf16.mxu0 %v855_v35  ;;  %v545_v11 = vrot.slane %v1243_v49, %v536_v2  ;;  %v577_v12 = vrot.slane %v526_v62, %v576_v3  ;;  %v461_v14 = vand.u32 15, %v435_v4  ;;  %v585_v15 = vrot.slane %v1243_v49, %v576_v3  ;;  %p932_p0 = scmp.ne.s32.totalorder %s736_s22, %s931_s23  ;;  %p937_p2 = scmp.lt.s32.totalorder %s931_s23, %s931_s23 }
  0x20   :  { %888 = vmatprep.subr.bf16.mxu1 %v887_v38  ;;  %v1253_v16 = vsub.s32 2, %v1112_v0  ;;  %v593_v17 = vrot.slane %v573_v6, %v1227_v61  ;;  %v447_v18 = vand.u32 15, %v433_v7  ;;  %v454_v19 = vand.u32 15, %v434_v8 }
  0x21   :  { %509 = vrot.lane.b32.xlu0 %v1172_v27, %s958_s18  ;;  %494 = vrot.lane.b32.xlu1 %v1204_v41, %s957_s17  ;;  %vm1256_vm2 = vcmp.eq.s32.totalorder %v440_v9, 0  ;;  %vm496_vm3 = vcmp.lt.s32.totalorder %v1224_v60, 1  ;;  %v537_v23 = vrot.slane %v526_v62, %v536_v2  ;;  %v541_v24 = vrot.slane %v1243_v49, %v1235_v1  ;;  %p938_p3 = por %p937_p2, %p936_p1 }
  0x22   :  { %858 = vmatpush3.bf16.msra.mxu0 %v857_v42  ;;  %v553_v26 = vrot.slane %v533_v10, %v1235_v1  ;;  %v565_v28 = vrot.slane %v545_v11, %v1235_v1  ;;  %v581_v29 = vrot.slane %v1243_v49, %v1227_v61  ;;  %v597_v30 = vrot.slane %v577_v12, %v1227_v61 }
  0x23   :  { %890 = vmatpush3.bf16.msra.mxu1 %v889_v43  ;;  %743 = vmatprep.subr.msk.mxu0 %vm256_vm0, %v250_v46  ;;  %vm1268_vm4 = vcmp.eq.s32.totalorder %v461_v14, 0  ;;  %v605_v34 = vrot.slane %v585_v15, %v1227_v61  ;;  %v617_v35 = vrot.slane %v526_v62, %v1253_v16  ;;  %v620_v36 = vsub.s32 6, %v1112_v0  ;;  %p939_p4 = pnand %p938_p3, %p932_p0 }
  0x24   :  { %746 = vmatprep.subr.msk.mxu1 %vm256_vm0, %v251_v47  ;;  %v606_v37 = vmul.f32 %v593_v17, %v1172_v27  ;;  %vm1278_vm5 = vcmp.eq.s32.totalorder %v447_v18, 0  ;;  %vm1282_vm6 = vcmp.eq.s32.totalorder %v454_v19, 0  ;;  %v557_v42 = vrot.slane %v537_v23, %v1235_v1 }
  0x25   :  { %170 = vmatmul.mubr.f32.vlgmr.msra.gmra.mrb[0].mxu0 %v1172_v27  ;;  %490 = vrot.lane.b32.xlu0 %v1184_v32, %s957_s17  ;;  %v561_v43 = vrot.slane %v541_v24, %v1235_v1  ;;  %vm517_vm7 = vcmp.lt.s32.totalorder %v1224_v60, 127  ;;  %v601_v27 = vrot.slane %v581_v29, %v1227_v61  ;;  %vm1295_vm8 = vcmp.eq.s32.totalorder %v440_v9, 15 }
  0x26   :  { %240 = vmatmul.mubr.f32.vlgmr.msra.gmra.mrb[0].mxu1 %v1187_v33  ;;  %744 = vmatpush1.msk.msra.mxu0 %vm256_vm0, %v246_v44  ;;  %vm1309_vm9 = vcmp.eq.s32.totalorder %v447_v18, 15  ;;  %vm1319_vm10 = vcmp.eq.s32.totalorder %v454_v19, 15  ;;  %v629_v61 = vrot.slane %v1243_v49, %v620_v36  ;;  %vm1326_vm11 = vcmp.eq.s32.totalorder %v461_v14, 15 }
  0x27   :  { %747 = vmatpush1.msk.msra.mxu1 %vm256_vm0, %v247_v45  ;;  %329 = vmatprep.mubr.f32.mxu0 %v956_v48  ;;  %v607_v45 = vmul.f32 %v597_v30, %v1184_v32  ;;  %v608_v8 = vmul.f32 %v601_v27, %v1187_v33  ;;  %v609_v12 = vmul.f32 %v605_v34, %v1204_v41 }
  0x28   :  { %400 = vmatprep.mubr.f32.mxu1 %v956_v48  ;;  %511 = vrot.lane.b32.xlu1 %v1184_v32, %s958_s18  ;;  %v649_v14 = vrot.slane %v629_v61, %v1253_v16 }
  0x29   :  { %513 = vrot.lane.b32.xlu0 %v1187_v33, %s958_s18 }
  0x2c   :  { %515 = vrot.lane.b32.xlu1 %v1204_v41, %s958_s18 }
  0x8f   :  { %v489_v58 = vpop.permute.xlu0 %488  ;;  %v493_v59 = vpop.permute.xlu1 %492 }
  0x93   :  { %v1232_v63 = vpop.permute.xlu0 %509  ;;  %v495_v5 = vpop.permute.xlu1 %494 }
  0x94   :  { %v500_v38 = vsel %vm496_vm3, %v495_v5, %v489_v58  ;;  %v497_v48 = vsel %vm496_vm3, %v493_v59, %v495_v5 }
  0x97   :  { %v491_v20 = vpop.permute.xlu0 %490 }
  0x98   :  { %v499_v0 = vsel %vm496_vm3, %v489_v58, %v491_v20  ;;  %v498_v44 = vsel %vm496_vm3, %v491_v20, %v493_v59 }
  0x9a   :  { %v512_v25 = vpop.permute.xlu1 %511 }
  0x9b   :  { %v514_v47 = vpop.permute.xlu0 %513  ;;  %v520_v32 = vsel %vm517_vm7, %v1232_v63, %v512_v25 }
  0x9c   :  { %v519_v58 = vsel %vm517_vm7, %v512_v25, %v514_v47  ;;  %v522_v5 = vsel %vm1295_vm8, 0.0, %v520_v32 }
  0x9d   :  { %v523_v9 = vsel %vm1309_vm9, 0.0, %v519_v58 }
  0xf8   :  { %v789_v50 = vpop.f32.mrb[0].mxu0 }
  0xf9   :  { %v824_v51 = vpop.f32.mrb[0].mxu1  ;;  %v790_v52 = vpop.f32.mrb[1].mxu0 }
  0xfa   :  { %v791_v53 = vadd.f32 %v790_v52, %v789_v50  ;;  %v825_v54 = vpop.f32.mrb[1].mxu1  ;;  %v501_v50 = vsel %vm1256_vm2, 0.0, %v500_v38  ;;  %v621_v52 = vrot.slane %v526_v62, %v620_v36  ;;  %v504_v62 = vsel %vm1268_vm4, 0.0, %v497_v48 }
  0xfb   :  { %v826_v55 = vadd.f32 %v825_v54, %v824_v51  ;;  %v637_v51 = vrot.slane %v617_v35, %v1253_v16  ;;  %v502_v54 = vsel %vm1278_vm5, 0.0, %v499_v0  ;;  %v566_v1 = vmul.f32 %v553_v26, %v501_v50 }
  0xfc   :  { %v567_v4 = vmul.f32 %v557_v42, %v502_v54  ;;  %v641_v6 = vrot.slane %v621_v52, %v1253_v16  ;;  %v569_v11 = vmul.f32 %v565_v28, %v504_v62 }
  0xfd   :  { %v242_v56 = vadd.f32 %v826_v55, %v791_v53  ;;  %v516_v53 = vpop.permute.xlu1 %515  ;;  %v610_v17 = vadd.f32 %v606_v37, %v566_v1  ;;  %v650_v18 = vmul.f32 %v637_v51, %v522_v5 }
  0xfe   :  { %v518_v3 = vsel %vm517_vm7, %v514_v47, %v516_v53  ;;  %v651_v33 = vmul.f32 %v641_v6, %v523_v9  ;;  %v613_v21 = vadd.f32 %v609_v12, %v569_v11 }
  0xff   :  { %v245_v57 = vmax.f32 %v242_v56, 0.0  ;;  %v625_v56 = vrot.slane %v1243_v49, %v1253_v16  ;;  %v521_v49 = vsel %vm517_vm7, %v516_v53, %v1232_v63  ;;  %v524_v15 = vsel %vm1319_vm10, 0.0, %v518_v3 }
 0x100   :  { %v525_v60 = vsel %vm1326_vm11, 0.0, %v521_v49  ;;  %v611_v63 = vadd.f32 %v607_v45, %v567_v4  ;;  %v654_v24 = vadd.f32 %v650_v18, %v610_v17 }
 0x101   :  { %745 = vmatmul.mubr.msk.f32.vlgmr.msra.gmra.mrb[2].mxu0 %vm252_vm1, %v245_v57  ;;  %748 = vmatmul.mubr.msk.f32.vlgmr.msra.gmra.mrb[2].mxu1 %vm252_vm1, %v245_v57  ;;  %v503_v57 = vsel %vm1282_vm6, 0.0, %v498_v44  ;;  %v645_v10 = vrot.slane %v625_v56, %v1253_v16  ;;  %v653_v23 = vmul.f32 %v649_v14, %v525_v60 }
 0x102   :  { %v568_v7 = vmul.f32 %v561_v43, %v503_v57  ;;  %v655_v25 = vadd.f32 %v651_v33, %v611_v63  ;;  %v753_v28 = vmul.f32 -1.442695, %v654_v24 }
 0x103   :  { %v652_v20 = vmul.f32 %v645_v10, %v524_v15  ;;  %v657_v41 = vadd.f32 %v653_v23, %v613_v21 }
 0x104   :  { %v612_v19 = vadd.f32 %v608_v8, %v568_v7  ;;  %v754_v16 = vmul.f32 -1.442695, %v655_v25  ;;  %899 = vpow2.f32 %v753_v28 }
 0x105   :  { %v756_v30 = vmul.f32 -1.442695, %v657_v41 }
 0x106   :  { %v656_v26 = vadd.f32 %v652_v20, %v612_v19  ;;  %901 = vpow2.f32 %v754_v16 }
 0x108   :  { %v755_v29 = vmul.f32 -1.442695, %v656_v26 }
 0x10a   :  { %903 = vpow2.f32 %v755_v29 }
 0x10b   :  { %905 = vpow2.f32 %v756_v30 }
 0x10e   :  { %v900_v42 = vpop.eup %899 }
 0x10f   :  { %v670_v44 = vadd.f32 1.0, %v900_v42 }
 0x110   :  { %v902_v43 = vpop.eup %901 }
 0x111   :  { %v671_v45 = vadd.f32 1.0, %v902_v43 }
 0x114   :  { %v904_v0 = vpop.eup %903 }
 0x115   :  { %v906_v27 = vpop.eup %905  ;;  %v672_v46 = vadd.f32 1.0, %v904_v0 }
 0x116   :  { %v673_v47 = vadd.f32 1.0, %v906_v27 }
 0x1d4   :  { %v331_v31 = vpop.f32.mrb[2].mxu0  ;;  %v402_v34 = vpop.f32.mrb[2].mxu1 }
 0x1d5   :  { %v749_v35 = vmul.f32 -1.442695, %v331_v31  ;;  %v751_v36 = vmul.f32 -1.442695, %v402_v34  ;;  %v333_v37 = vpop.f32.mrb[3].mxu0  ;;  %v404_v38 = vpop.f32.mrb[3].mxu1 }
 0x1d6   :  { %v750_v39 = vmul.f32 -1.442695, %v333_v37  ;;  %v752_v40 = vmul.f32 -1.442695, %v404_v38 }
 0x1d7   :  { %907 = vpow2.f32 %v749_v35 }
 0x1d8   :  { %909 = vpow2.f32 %v751_v36 }
 0x1d9   :  { %911 = vpow2.f32 %v750_v39 }
 0x1da   :  { %913 = vpow2.f32 %v752_v40 }
 0x1db   :  { %915 = vrcp.f32 %v670_v44 }
 0x1dc   :  { %917 = vrcp.f32 %v671_v45 }
 0x1dd   :  { %919 = vrcp.f32 %v672_v46 }
 0x1de   :  { %921 = vrcp.f32 %v673_v47 }
 0x1e1   :  { %v908_v48 = vpop.eup %907 }
 0x1e2   :  { %v910_v50 = vpop.eup %909  ;;  %v419_v51 = vadd.f32 1.0, %v908_v48 }
 0x1e3   :  { %v912_v52 = vpop.eup %911  ;;  %v421_v53 = vadd.f32 1.0, %v910_v50 }
 0x1e4   :  { %v914_v54 = vpop.eup %913  ;;  %923 = vrcp.f32 %v419_v51  ;;  %v420_v32 = vadd.f32 1.0, %v912_v52 }
 0x1e5   :  { %925 = vrcp.f32 %v421_v53  ;;  %v422_v55 = vadd.f32 1.0, %v914_v54  ;;  %v916_v56 = vpop.eup %915 }
 0x1e6   :  { %927 = vrcp.f32 %v420_v32  ;;  %v918_v57 = vpop.eup %917 }
 0x1e7   :  { %929 = vrcp.f32 %v422_v55  ;;  %v920_v58 = vpop.eup %919  ;;  %v709_v2 = vcombine.low %v916_v56, %v918_v57 }
 0x1e8   :  { %v922_v59 = vpop.eup %921 }
 0x1e9   :  { %v710_v3 = vcombine.low %v920_v58, %v922_v59  ;;  %v717_v8 = vrot.slane %v709_v2, %v1139_v13 }
 0x1eb   :  { %v724_v9 = vrot.slane %v710_v3, %v1139_v13 }
 0x1ed   :  { %v725_v12 = vcombine.low %v717_v8, %v724_v9 }
 0x1ee   :  { %v924_v61 = vpop.eup %923 }
 0x1ef   :  { %v926_v62 = vpop.eup %925 }
 0x1f0   :  { %v928_v1 = vpop.eup %927 }
 0x1f1   :  { %v930_v4 = vpop.eup %929  ;;  %v686_v5 = vcombine.low %v924_v61, %v928_v1 }
 0x1f2   :  { %v687_v6 = vcombine.low %v926_v62, %v930_v4 }
 0x1f3   :  { %v694_v49 = vrot.slane %v686_v5, %v1139_v13 }
 0x1f4   :  { %v701_v7 = vrot.slane %v687_v6, %v1139_v13 }
 0x1f6   :  { %v702_v10 = vcombine.low %v694_v49, %v701_v7 }
 0x1f8   :  { %v704_v11 = vmul.f32 %v702_v10, %v1159_v22 }
 0x1fa   :  { %v727_v14 = vmul.f32 %v725_v12, %v704_v11 }
 0x1fc   :  { %728 = vst [vmem:[#allocation2] sm:$0xff] %v727_v14 }
 0x1fd   :  { %942 = shalt.err (!%p939_p4)
}
 0x1fe   :  { %s943_s26 = scalar_lea.hbm %s1369_s4, 128 }
 0x1ff   :  { %p944_p5 = scmp.ne.s32.totalorder %s1369_s4, %s943_s26  ;;  %p947_p6 = scmp.lt.u32.totalorder %s943_s26, %s1369_s4 }
 0x201   :  { %p949_p7 = pnand %p947_p6, %p944_p5 }
 0x203   :  { %952 = shalt.err (!%p949_p7)
}
 0x204   :  { %738 = dma.vmem_to_hbm [thread:$0]  %s736_s22, 128, %s1369_s4, [#allocation3]  }
 0x205   :  { %953 = dma.done.wait [#allocation3], 128  }
 0x206   :  { %954 = vsyncadd [#allocation3], 4294967168 }
 0x207   :  { %742 = vsyncpa [#allocation3], 1 }

</bundles_post_ra>
